<compile_context>
chip_gen: v5e
topology: v5e:2x2
jax: 0.10.0
libtpu: 0.0.40
codegen_flags: <defaults>
</compile_context>

<pallas_src>
import jax
import jax.numpy as jnp
from jax import lax
from jax.experimental import pallas as pl
from jax.experimental.pallas import tpu as pltpu


def testnet_kernel(x_ref, a_ref, b_ref, o_ref):
    # x_ref: [TN, Cin*H*W]  VMEM  (lane-dense: last dim a multiple of 128)
    # a_ref: [1,  Cin*H*W]  VMEM  folded (conv . pool . linear) weight image
    # b_ref: [1, 1]         SMEM  folded scalar bias
    # o_ref: [TN, 1]        VMEM
    x = x_ref[...]
    a = a_ref[...]                                   # broadcasts over sublanes
    s = jnp.sum(x * a, axis=-1, keepdims=True)       # VPU mul + XLU lane-reduce
    o_ref[...] = (s + b_ref[0, 0]).astype(o_ref.dtype)


def testnet_forward(x_nchw, conv_w, conv_b, mlp_w, mlp_b):
    N, Cin, H, W = x_nchw.shape
    Cout, _, KH, KW = conv_w.shape
    OH, OW = H - KH + 1, W - KW + 1
    CHW = Cin * H * W

    # ---- constant-fold the weights (all layers are linear; GAP is linear) ----
    # Fold Linear(5,1) into the conv weight:
    #   w_eff[ci,kh,kw] = sum_co mlp_w[0,co] * conv_w[co,ci,kh,kw]
    w_eff = jnp.einsum('o,oikl->ikl',
                       mlp_w[0].astype(jnp.float32),
                       conv_w.astype(jnp.float32))            # [Cin, KH, KW]
    # Fold VALID conv + global average pool into a per-pixel weight image:
    #   A[ci,h,w] = (1/(OH*OW)) * sum_{(kh,kw): 0<=h-kh<OH, 0<=w-kw<OW} w_eff[ci,kh,kw]
    a_img = jnp.zeros((Cin, H, W), jnp.float32)
    for kh in range(KH):                                      # static 3x3 tap loop
        for kw in range(KW):
            a_img = a_img.at[:, kh:kh + OH, kw:kw + OW].add(
                w_eff[:, kh, kw][:, None, None])
    a2d = (a_img / float(OH * OW)).reshape(1, CHW)
    # Folded bias: GAP passes the conv bias through unchanged.
    b_eff = (jnp.sum(conv_b.astype(jnp.float32) * mlp_w[0].astype(jnp.float32))
             + mlp_b[0]).reshape(1, 1).astype(jnp.float32)

    # ---- lane-dense input: pure reshape of NCHW (no transpose, no relayout) ----
    x2d = x_nchw.reshape(N, CHW).astype(jnp.float32)          # 3*16*16 = 768 lanes

    TN = N if N <= 8 else 8            # batch tile: full batch here, 8-row tiles at scale
    grid = (pl.cdiv(N, TN),)

    return pl.pallas_call(
        testnet_kernel,
        out_shape=jax.ShapeDtypeStruct((N, 1), jnp.float32),
        grid=grid,
        in_specs=[
            pl.BlockSpec((TN, CHW), lambda i: (i, 0)),            # x: batch-tiled
            pl.BlockSpec((1, CHW), lambda i: (0, 0)),             # A: resident every step
            pl.BlockSpec(memory_space=pltpu.MemorySpace.SMEM),    # folded bias scalar
        ],
        out_specs=pl.BlockSpec((TN, 1), lambda i: (i, 0)),
        compiler_params=pltpu.CompilerParams(
            dimension_semantics=("parallel",)),                   # v7x: 2 TCs share batch
    )(x2d, a2d, b_eff)


def _reference(x_nchw, conv_w, conv_b, mlp_w, mlp_b):
    # Pure-JAX reference (mirrors the PyTorch module exactly).
    y = lax.conv_general_dilated(
        x_nchw, conv_w, window_strides=(1, 1), padding="VALID",
        dimension_numbers=("NCHW", "OIHW", "NCHW"))
    y = y + conv_b.reshape(1, -1, 1, 1)
    g = jnp.mean(y, axis=(2, 3))                                  # [N, Cout]
    return g @ mlp_w.T + mlp_b                                    # [N, 1]


if __name__ == "__main__":
    key = jax.random.PRNGKey(0)
    N, Cin, H, W = 2, 3, 16, 16
    Cout, K = 5, 3

    x = jax.random.normal(key, (N, Cin, H, W), dtype=jnp.float32)

    # Deterministic parameter init (matches _torch_init_weights: all ones).
    conv_w = jnp.ones((Cout, Cin, K, K), jnp.float32)   # torch Conv2d weight [O, I, KH, KW]
    conv_b = jnp.ones((Cout,), jnp.float32)
    mlp_w = jnp.ones((1, Cout), jnp.float32)            # torch Linear weight [out, in]
    mlp_b = jnp.ones((1,), jnp.float32)

    out = testnet_forward(x, conv_w, conv_b, mlp_w, mlp_b)
    out = jax.block_until_ready(out)

    ref = _reference(x, conv_w, conv_b, mlp_w, mlp_b)
    assert out.shape == (N, 1), out.shape
    assert jnp.allclose(out, ref, atol=1e-4, rtol=1e-4), (out, ref)

    print("KERNEL_OK")
</pallas_src>

<mosaic_0001>
module attributes {stable_mosaic.version = 11 : i64} {
  func.func @testnet_kernel(%arg0: i32, %arg1: memref<2x768xf32, #tpu.memory_space<vmem>>, %arg2: memref<1x768xf32, #tpu.memory_space<vmem>>, %arg3: memref<1x1xf32, #tpu.memory_space<smem>>, %arg4: memref<2x1xf32, #tpu.memory_space<vmem>>) attributes {dimension_semantics = [#tpu.dimension_semantics<parallel>], iteration_bounds = array<i64: 1>, scalar_prefetch = 0 : i64, scratch_operands = 0 : i64, tpu.core_type = #tpu.core_type<tc>, window_params = [{transform_indices = @transform_0, window_bounds = array<i64: 2, 768>}, {pipeline_mode = #tpu.pipeline_mode<synchronous>, transform_indices = @transform_1, window_bounds = array<i64: 1, 768>}, {transform_indices = @transform_2, window_bounds = array<i64: 1, 1>}, {transform_indices = @transform_3, window_bounds = array<i64: 2, 1>}]} {
    %c0 = arith.constant 0 : index
    %c0_0 = arith.constant 0 : index
    %0 = vector.load %arg1[%c0, %c0_0] : memref<2x768xf32, #tpu.memory_space<vmem>>, vector<2x768xf32>
    %c0_1 = arith.constant 0 : index
    %c0_2 = arith.constant 0 : index
    %1 = vector.load %arg2[%c0_1, %c0_2] : memref<1x768xf32, #tpu.memory_space<vmem>>, vector<1x768xf32>
    %2 = vector.broadcast %1 : vector<1x768xf32> to vector<2x768xf32>
    %3 = arith.mulf %0, %2 : vector<2x768xf32>
    %cst = arith.constant dense<0.000000e+00> : vector<2xf32>
    %4 = vector.multi_reduction <add>, %3, %cst [1] : vector<2x768xf32> to vector<2xf32>
    %5 = vector.shape_cast %4 : vector<2xf32> to vector<2x1xf32>
    %c0_3 = arith.constant 0 : index
    %c0_4 = arith.constant 0 : index
    %6 = memref.load %arg3[%c0_3, %c0_4] : memref<1x1xf32, #tpu.memory_space<smem>>
    %7 = vector.broadcast %6 : f32 to vector<2x1xf32>
    %8 = arith.addf %5, %7 : vector<2x1xf32>
    %c0_5 = arith.constant 0 : index
    %c0_6 = arith.constant 0 : index
    %9 = vector.load %arg4[%c0_5, %c0_6] : memref<2x1xf32, #tpu.memory_space<vmem>>, vector<2x1xf32>
    tpu.vector_store %arg4[%c0_5, %c0_6], %8 {strides = array<i32>} : memref<2x1xf32, #tpu.memory_space<vmem>>, vector<2x1xf32>,
    return
  }
  func.func @transform_0(%arg0: i32) -> (i32, i32) {
    %c0_i32 = arith.constant 0 : i32
    %c0_i32_0 = arith.constant 0 : i32
    return %arg0, %c0_i32 : i32, i32
  }
  func.func @transform_1(%arg0: i32) -> (i32, i32) {
    %c0_i32 = arith.constant 0 : i32
    %c0_i32_0 = arith.constant 0 : i32
    %c0_i32_1 = arith.constant 0 : i32
    return %c0_i32, %c0_i32_0 : i32, i32
  }
  func.func @transform_2(%arg0: i32) -> (i32, i32) {
    %c0_i32 = arith.constant 0 : i32
    %c0_i32_0 = arith.constant 0 : i32
    %c0_i32_1 = arith.constant 0 : i32
    return %c0_i32, %c0_i32_0 : i32, i32
  }
  func.func @transform_3(%arg0: i32) -> (i32, i32) {
    %c0_i32 = arith.constant 0 : i32
    %c0_i32_0 = arith.constant 0 : i32
    return %arg0, %c0_i32 : i32, i32
  }
}

</mosaic_0001>

<bundles_post_ra>
// kernel: tpu_custom_call.1
= control target key start
LH: loop header
LB: loop body
LE: loop exit
PB: predicated region body
PF: predicated region fallthrough
CT: control target
= control target key end

     0   :  { %9 = vsyncpa [#allocation4], 0  ;;  %s205_s0 = inlined_call_operand.hbm [shape: f32[2,768], index: 0, kind: input, shape index: {}]   ;;  %s206_s1 = inlined_call_operand.hbm [shape: f32[1,768], index: 1, kind: input, shape index: {}]   ;;  %s207_s2 = inlined_call_operand.<no memory space> [shape: f32[1,1], index: 2, kind: input, shape index: {}]   ;;  %s208_s3 = inlined_call_operand.vmem [shape: f32[2,1], index: 3, kind: output, shape index: {}]  }
   0x1   :  { %s16_s14 = sshll.u32 %s205_s0, 4  ;;  %s17_s14 = int_to_ptr.hbm [resolvable:$true] %s16_s14 }
   0x2   :  { %10 = vsyncpa [#allocation6], 0  ;;  %s163_s15 = smov [#allocation3]   ;;  %s27_s19 = sshll.u32 %s206_s1, 4  ;;  %s28_s19 = int_to_ptr.hbm [resolvable:$true] %s27_s19 }
   0x3   :  { %s18_s16 = sshll.u32 %s163_s15, 4  ;;  %s164_s20 = smov [#allocation5]   ;;  %s19_s16 = int_to_ptr.vmem [resolvable:$true] %s18_s16 }
   0x4   :  { %21 = dma.hbm_to_vmem [thread:$0]  %s17_s14, 192, %s19_s16, [#allocation4]  }
   0x5   :  { %s29_s21 = sshll.u32 %s164_s20, 4  ;;  %s30_s21 = int_to_ptr.vmem [resolvable:$true] %s29_s21 }
   0x6   :  { %32 = dma.hbm_to_vmem [thread:$0]  %s28_s19, 96, %s30_s21, [#allocation6]  }
   0x7   :  { %159 = dma.done.wait [#allocation4], 192  }
   0x8   :  { %160 = vsyncadd [#allocation4], 4294967104 }
   0x9   :  { %161 = dma.done.wait [#allocation6], 96  }
   0xa   :  { %162 = vsyncadd [#allocation6], 4294967200  ;;  %v45_v0 = vld [vmem:[#allocation5] sm:$0x3f]  ;;  %vm57_vm0 = vcmask 1041408   ;;  %vm59_vm1 = vcmask 1045508   ;;  %v99_v36 = vstv %s207_s2 }
   0xb   :  { %v47_v1 = vperm.slane %v45_v0, 0  ;;  %v48_v2 = vperm.slane %v45_v0, 1  ;;  %v49_v3 = vperm.slane %v45_v0, 2  ;;  %v50_v4 = vperm.slane %v45_v0, 3  ;;  %v43_v10 = vld [vmem:[#allocation3] sm:$0xff] }
   0xc   :  { %v51_v5 = vperm.slane %v45_v0, 4  ;;  %v52_v6 = vperm.slane %v45_v0, 5  ;;  %vm61_vm2 = vcmask 1043456   ;;  %v44_v11 = vld [vmem:[#allocation3 + $0x8] sm:$0xf]  ;;  %vm101_vm3 = vcmask 1024  }
   0xd   :  { %v53_v7 = vrot.slane %v48_v2, 6  ;;  %v54_v8 = vrot.slane %v49_v3, 4  ;;  %v55_v9 = vrot.slane %v50_v4, 2 }
   0xe   :  { %v56_v12 = vrot.slane %v52_v6, 6 }
   0xf   :  { %v58_v13 = vsel %vm57_vm0, %v47_v1, %v53_v7  ;;  %v60_v14 = vsel %vm59_vm1, %v54_v8, %v55_v9 }
  0x10   :  { %v62_v15 = vsel %vm61_vm2, %v58_v13, %v60_v14  ;;  %v63_v16 = vsel %vm57_vm0, %v51_v5, %v56_v12 }
  0x11   :  { %v66_v17 = vmul.f32 %v62_v15, %v43_v10  ;;  %v67_v18 = vmul.f32 %v63_v16, %v44_v11 }
  0x13   :  { %70 = vst [vmem:[#allocation1] ss:$4 sm:$0xff] %v66_v17 }
  0x14   :  { %72 = vst [vmem:[#allocation1 + $0x20] ss:$4 sm:$0xff] %v67_v18 }
  0x1a   :  { %v73_v19 = vld.sshfl [vmem:[#allocation1] sm:$0xff pattern:$0x73625140]  ;;  %v74_v20 = vld.sshfl [vmem:[#allocation1 + $0x8] sm:$0xff pattern:$0x73625140] }
  0x1b   :  { %v75_v21 = vld.sshfl [vmem:[#allocation1 + $0x10] sm:$0xff pattern:$0x73625140]  ;;  %v76_v22 = vld.sshfl [vmem:[#allocation1 + $0x18] sm:$0xff pattern:$0x73625140] }
  0x1c   :  { %v85_v23 = vsel %vm57_vm0, %v73_v19, 0.0  ;;  %v86_v24 = vsel %vm57_vm0, %v74_v20, 0.0  ;;  %v88_v25 = vsel %vm57_vm0, %v75_v21, 0.0  ;;  %v77_v26 = vld.sshfl [vmem:[#allocation1 + $0x20] sm:$0xff pattern:$0x73625140] }
  0x1d   :  { %v87_v27 = vadd.f32 %v86_v24, %v85_v23  ;;  %v90_v28 = vsel %vm57_vm0, %v76_v22, 0.0  ;;  %v78_v29 = vld.sshfl [vmem:[#allocation1 + $0x28] sm:$0xff pattern:$0x73625140]  ;;  %v92_v31 = vsel %vm57_vm0, %v77_v26, 0.0 }
  0x1e   :  { %v94_v33 = vsel %vm57_vm0, %v78_v29, 0.0 }
  0x1f   :  { %v89_v30 = vadd.f32 %v88_v25, %v87_v27 }
  0x21   :  { %v91_v32 = vadd.f32 %v90_v28, %v89_v30 }
  0x23   :  { %v93_v34 = vadd.f32 %v92_v31, %v91_v32 }
  0x25   :  { %v95_v35 = vadd.f32 %v94_v33, %v93_v34 }
  0x27   :  { %96 = vadd.xlane.f32.xlu0 %v95_v35 }
  0x9a   :  { %v97_v37 = vpop.xlane.xlu0 %96 }
  0x9b   :  { %v100_v38 = vadd.f32 %v99_v36, %v97_v37 }
  0x9d   :  { %102 = vst.msk [vmem:[%s208_s3] sm:$0x3] %vm101_vm3, %v100_v38 }
  0x9e   :  { %107 = vsyncpa [#allocation4], 1 }
  0x9f   :  { %108 = vsyncpa [#allocation6], 1 }

</bundles_post_ra>
